<compile_context>
chip_gen: v7x
topology: tpu7x:2x2x1
jax: 0.10.0
libtpu: 0.0.40
codegen_flags: <defaults>
</compile_context>

<pallas_src>
import jax
import jax.numpy as jnp
from jax.experimental import pallas as pl
from jax.experimental.pallas import tpu as pltpu


def _round_up(x, m):
    return (x + m - 1) // m * m


def _vmem_limits():
    """(compiler vmem limit, tile-sizing budget) in bytes, per generation."""
    phys = 64 << 20                       # conservative default (v7x per-core VMEM)
    try:
        phys = int(pltpu.get_tpu_info().vmem_capacity_bytes)
    except Exception:
        pass
    limit = min(phys * 3 // 4, 100 << 20)   # ~48 MiB on v7x, ~96-100 MiB on v5e/v6e
    budget = limit * 3 // 4
    return int(limit), int(budget)


def _estimate_vmem_bytes(TH, w, Cin, Cs, Cop):
    """Rough per-grid-step VMEM footprint of a TH-row tile (bytes)."""
    th = TH // 2
    Ctot = Cin + Cs
    rows = TH + 2
    blocks = (2 * (th + 2) * w * Cin * 2            # x core + halos (bf16, double-buf)
              + 2 * rows * w * 2 * Cs * 2           # skip core + halos (bf16, double-buf)
              + 2 * TH * w * 2 * Cop * 4            # output tile (f32, double-buf)
              + 2 * (3 * 4 * Ctot) * 2 * Cop * 2    # packed weights (bf16, double-buf)
              + 2 * 2 * Cop * 4)                    # bias
    inter = (rows * w * (6 * Cin * 4                # f32 row/column upsample temps
                         + (2 * Cin + 4 * Cs + 8 * Ctot) * 2)  # bf16 ev/od/feat temps
             + 2 * TH * w * 2 * Cop * 4)            # f32 accumulator + store temp
    return blocks + inter


def _pick_row_tile(H, w, Cin, Cs, Cop, budget_bytes):
    """Largest even divisor of H (<=128) whose tile fits the VMEM budget,
    capped at H//2 so every image yields >= 2 row tiles (megacore + pipelining)."""
    max_th = 2 if H <= 2 else H // 2
    cands = [t for t in range(2, max_th + 1, 2) if H % t == 0] or [2]
    best = cands[0]
    for t in cands:
        if t <= 128 and _estimate_vmem_bytes(t, w, Cin, Cs, Cop) <= budget_bytes:
            best = t
    return best


def _decoder_kernel(xc_ref, xt_ref, xb_ref, sc_ref, st_ref, sb_ref,
                    wp_ref, b_ref, o_ref):
    """Fused upsample + concat + 3x3 conv + bias + ReLU for one row tile.

    Column-pair layout: low-res column c carries output columns 2c / 2c+1.
      xc_ref: (1, th, w, Cin)     bf16   core low-res x rows of this tile
      xt_ref: (1, 1,  w, Cin)     bf16   clamped low-res row above the tile
      xb_ref: (1, 1,  w, Cin)     bf16   clamped low-res row below the tile
      sc_ref: (1, TH, w, 2*Cs)    bf16   core skip rows (column-pair layout)
      st_ref: (1, 1,  w, 2*Cs)    bf16   clamped skip row above
      sb_ref: (1, 1,  w, 2*Cs)    bf16   clamped skip row below
      wp_ref: (3, 4*Ctot, 2*Cop)  bf16   packed conv weights (per kernel row dy)
      b_ref : (1, 2*Cop)          f32    bias, repeated for even/odd columns
      o_ref : (1, TH, w, 2*Cop)   f32    output tile (column-pair layout)
    """
    ti = pl.program_id(1)
    nrt = pl.num_programs(1)

    _, TH, w2, cop2 = o_ref.shape
    cin = xc_ref.shape[3]
    cs = sc_ref.shape[3] // 2
    ctot = cin + cs
    k1 = 4 * ctot

    f32 = jnp.float32
    bf16 = jnp.bfloat16

    # ---- low-res x rows incl. clamped 1-row halo: (th+2, w, Cin); f32 blends
    xl = jnp.concatenate([xt_ref[0], xc_ref[0], xb_ref[0]], axis=0).astype(f32)

    # ---- bilinear x2 row upsample (align_corners=False): window rows 0..TH+1
    a = xl[:-1]
    b = xl[1:]
    up_even = 0.75 * a + 0.25 * b             # window rows 0, 2, ..., TH
    up_odd = 0.25 * a + 0.75 * b              # window rows 1, 3, ..., TH+1
    L = jnp.stack([up_even, up_odd], axis=1).reshape(TH + 2, w2, cin)

    # conv zero-padding of the global top/bottom border: zero only the halo row
    # that falls outside the image, applied on the narrow L (Cin) and skip
    # (2*Cs) tensors instead of the 4*Ctot-wide feat tensor.
    r = jax.lax.broadcasted_iota(jnp.int32, (TH + 2, 1, 1), 0)
    pad_row = jnp.logical_or(jnp.logical_and(ti == 0, r == 0),
                             jnp.logical_and(ti == nrt - 1, r == TH + 1))
    L = jnp.where(pad_row, jnp.zeros((), f32), L)

    # ---- bilinear x2 column upsample, kept in column-pair space
    Ll = jnp.concatenate([L[:, :1], L[:, :-1]], axis=1)    # clamped shift (c-1)
    Lr = jnp.concatenate([L[:, 1:], L[:, -1:]], axis=1)    # clamped shift (c+1)
    ex = (0.25 * Ll + 0.75 * L).astype(bf16)  # x_up at even output columns 2c
    ox = (0.75 * L + 0.25 * Lr).astype(bf16)  # x_up at odd  output columns 2c+1

    # ---- skip rows incl. clamped conv halo rows (bf16, column-pair layout)
    sk = jnp.concatenate([st_ref[0], sc_ref[0], sb_ref[0]], axis=0)
    sk = jnp.where(pad_row, jnp.zeros((), bf16), sk)
    sk_e = sk[:, :, :cs]
    sk_o = sk[:, :, cs:]

    # fused channel concat: cat([x_up, skip], C) at even / odd output columns
    ev = jnp.concatenate([ex, sk_e], axis=-1)               # (TH+2, w, Ctot)
    od = jnp.concatenate([ox, sk_o], axis=-1)

    # conv column taps in pair space: feat = [od[c-1], ev[c], od[c], ev[c+1]]
    zc = jnp.zeros((TH + 2, 1, ctot), bf16)
    od_l = jnp.concatenate([zc, od[:, :-1]], axis=1)        # zero conv pad, col -1
    ev_r = jnp.concatenate([ev[:, 1:], zc], axis=1)         # zero conv pad, col W
    feat = jnp.concatenate([od_l, ev, od, ev_r], axis=-1)   # (TH+2, w, 4*Ctot) bf16

    # ---- 3x3 conv = 3 accumulating bf16 MXU matmuls (one per kernel row dy),
    # f32 accumulation; never materializes a 12*Ctot-wide im2col buffer.
    # TODO(synk): for MXU-bound big-channel blocks, split even/odd matmuls
    # (K=3*Ctot each) to drop the 25% structurally-zero K columns.
    acc = None
    for dy in range(3):
        tap = feat[dy:dy + TH].reshape(TH * w2, k1)
        part = jnp.dot(tap, wp_ref[dy], preferred_element_type=f32)
        acc = part if acc is None else acc + part
    acc = acc + b_ref[...]
    o_ref[0] = jnp.maximum(acc, 0.0).reshape(TH, w2, cop2).astype(o_ref.dtype)


def decoder_block_forward(x_nchw, skip_nchw, weight, bias, *, row_tile=None):
    """DecoderBlock forward.

    x_nchw   : (N, Cin, h, w)
    skip_nchw: (N, Cs, 2h, 2w)
    weight   : (Cout, Cin + Cs, 3, 3)   (PyTorch Conv2d layout)
    bias     : (Cout,)
    returns  : (N, Cout, 2h, 2w) float32
    """
    # TODO(synk): the optional `skip is None` branch of the module is not
    # implemented; a skip tensor is required.
    N, Cin, h, w = x_nchw.shape
    Cs = skip_nchw.shape[1]
    Cout = weight.shape[0]
    H, W = 2 * h, 2 * w
    Ctot = Cin + Cs
    Cop = _round_up(Cout, 64)            # 2*Cop is lane-dense (multiple of 128)

    vmem_limit, vmem_budget = _vmem_limits()
    if row_tile is None:
        row_tile = _pick_row_tile(H, w, Cin, Cs, Cop, vmem_budget)
    TH = row_tile
    assert TH % 2 == 0 and H % TH == 0, (TH, H)
    th = TH // 2
    nrt = H // TH

    # layout glue: NCHW -> NHWC, activations cast to bf16 (halves input DMA).
    # TODO(synk): accept/emit NHWC directly to drop the two transposes.
    x = jnp.transpose(x_nchw, (0, 2, 3, 1)).astype(jnp.bfloat16)
    skip = jnp.transpose(skip_nchw, (0, 2, 3, 1)).astype(jnp.bfloat16)
    skip_p = skip.reshape(N, H, w, 2 * Cs)     # free column-pair view

    # pack conv weights for column-pair space, per kernel row dy:
    #   even out cols 2c  : taps dx=0,1,2 hit [od[c-1], ev[c], od[c]]
    #   odd  out cols 2c+1: taps dx=0,1,2 hit [ev[c],  od[c],  ev[c+1]]
    w_hwio = jnp.transpose(weight, (2, 3, 1, 0)).astype(jnp.float32)
    w_hwio = jnp.pad(w_hwio, ((0, 0), (0, 0), (0, 0), (0, Cop - Cout)))
    wp = jnp.zeros((3, 4 * Ctot, 2 * Cop), jnp.float32)
    wp = wp.at[:, 0 * Ctot:1 * Ctot, :Cop].set(w_hwio[:, 0])
    wp = wp.at[:, 1 * Ctot:2 * Ctot, :Cop].set(w_hwio[:, 1])
    wp = wp.at[:, 2 * Ctot:3 * Ctot, :Cop].set(w_hwio[:, 2])
    wp = wp.at[:, 1 * Ctot:2 * Ctot, Cop:].set(w_hwio[:, 0])
    wp = wp.at[:, 2 * Ctot:3 * Ctot, Cop:].set(w_hwio[:, 1])
    wp = wp.at[:, 3 * Ctot:4 * Ctot, Cop:].set(w_hwio[:, 2])
    wp = wp.astype(jnp.bfloat16)
    # TODO(synk): single-buffer wp/bp (constant index_map) via
    # pipeline_mode=pl.Buffered(1) to reclaim the second weight buffer on the
    # big-channel blocks.

    bp = jnp.pad(bias.astype(jnp.float32), (0, Cop - Cout))
    bp = jnp.concatenate([bp, bp]).reshape(1, 2 * Cop)

    out_pairs = pl.pallas_call(
        _decoder_kernel,
        out_shape=jax.ShapeDtypeStruct((N, H, w, 2 * Cop), jnp.float32),
        grid_spec=pltpu.PrefetchScalarGridSpec(
            num_scalar_prefetch=0,
            grid=(N, nrt),
            in_specs=[
                # low-res x: core rows + clamped 1-row halos for the upsample
                pl.BlockSpec((1, th, w, Cin), lambda n, t: (n, t, 0, 0)),
                pl.BlockSpec((1, 1, w, Cin),
                             lambda n, t: (n, jnp.maximum(t * th - 1, 0), 0, 0)),
                pl.BlockSpec((1, 1, w, Cin),
                             lambda n, t: (n, jnp.minimum(t * th + th, h - 1), 0, 0)),
                # skip (column-pair layout): core rows + clamped 1-row conv halos
                pl.BlockSpec((1, TH, w, 2 * Cs), lambda n, t: (n, t, 0, 0)),
                pl.BlockSpec((1, 1, w, 2 * Cs),
                             lambda n, t: (n, jnp.maximum(t * TH - 1, 0), 0, 0)),
                pl.BlockSpec((1, 1, w, 2 * Cs),
                             lambda n, t: (n, jnp.minimum(t * TH + TH, H - 1), 0, 0)),
                # packed weights / bias (constant index -> fetched once)
                pl.BlockSpec((3, 4 * Ctot, 2 * Cop), lambda n, t: (0, 0, 0)),
                pl.BlockSpec((1, 2 * Cop), lambda n, t: (0, 0)),
            ],
            out_specs=pl.BlockSpec((1, TH, w, 2 * Cop),
                                   lambda n, t: (n, t, 0, 0)),
        ),
        compiler_params=pltpu.CompilerParams(
            dimension_semantics=("parallel", "parallel"),
            vmem_limit_bytes=int(vmem_limit)),
    )(x, x, x, skip_p, skip_p, skip_p, wp, bp)

    # unpack column pairs (pure reshape), drop channel padding, back to NCHW
    out_nhwc = out_pairs.reshape(N, H, W, Cop)[..., :Cout]
    return jnp.transpose(out_nhwc, (0, 3, 1, 2))


# ----------------------------- pure-JAX reference ----------------------------
def _upsample2x_bilinear_nhwc(x):
    """Bilinear x2 upsample, align_corners=False (matches nn.Upsample)."""
    def up_axis(a, axis):
        n = a.shape[axis]
        idx = jnp.arange(n)
        left = jnp.clip(idx - 1, 0, n - 1)
        right = jnp.clip(idx + 1, 0, n - 1)
        a_l = jnp.take(a, left, axis=axis)
        a_r = jnp.take(a, right, axis=axis)
        even = 0.25 * a_l + 0.75 * a
        odd = 0.75 * a + 0.25 * a_r
        stacked = jnp.stack([even, odd], axis=axis + 1)
        new_shape = list(a.shape)
        new_shape[axis] = 2 * n
        return stacked.reshape(new_shape)

    x = up_axis(x, 1)
    x = up_axis(x, 2)
    return x


def _reference(x_nchw, skip_nchw, weight, bias):
    x = jnp.transpose(x_nchw, (0, 2, 3, 1))
    skip = jnp.transpose(skip_nchw, (0, 2, 3, 1))
    x_up = _upsample2x_bilinear_nhwc(x)
    cat = jnp.concatenate([x_up, skip], axis=-1)
    out = jax.lax.conv_general_dilated(
        cat, jnp.transpose(weight, (2, 3, 1, 0)),
        window_strides=(1, 1), padding="SAME",
        dimension_numbers=("NHWC", "HWIO", "NHWC"))
    out = jnp.maximum(out + bias.reshape(1, 1, 1, -1), 0.0)
    return jnp.transpose(out, (0, 3, 1, 2))


if __name__ == "__main__":
    key = jax.random.PRNGKey(0)
    k1, k2, k3, k4 = jax.random.split(key, 4)

    # small shapes consistent with the module:
    #   in_channels=4, skip_channels=4, out_channels=8
    #   x is (N, Cin, 8, 8); skip is at 2x spatial resolution (16, 16)
    N, Cin, Cs, Cout = 2, 4, 4, 8
    h = w = 8
    x = jax.random.normal(k1, (N, Cin, h, w), jnp.float32)
    skip = jax.random.normal(k2, (N, Cs, 2 * h, 2 * w), jnp.float32)
    weight = jax.random.normal(k3, (Cout, Cin + Cs, 3, 3), jnp.float32) * 0.1
    bias = jax.random.normal(k4, (Cout,), jnp.float32) * 0.1

    ref = _reference(x, skip, weight, bias)

    # default (auto-picked) row tile: H=16 -> TH=8, 2 row tiles per image
    out = jax.jit(decoder_block_forward)(x, skip, weight, bias)
    out = jax.block_until_ready(out)
    assert out.shape == (N, Cout, 2 * h, 2 * w)
    err = float(jnp.max(jnp.abs(out - ref)))
    assert jnp.allclose(out, ref, atol=2e-2, rtol=2e-2), f"default tile err={err}"

    # force a tiny row tile to exercise the interior halo / boundary paths
    out_small = jax.block_until_ready(
        decoder_block_forward(x, skip, weight, bias, row_tile=2))
    err2 = float(jnp.max(jnp.abs(out_small - ref)))
    assert jnp.allclose(out_small, ref, atol=2e-2, rtol=2e-2), f"row_tile=2 err={err2}"

    # a second config: batch 1, Cin != Cs, Cout not a multiple of the padding
    N2, Cin2, Cs2, Cout2, h2, w2 = 1, 6, 2, 5, 4, 8
    x2 = jax.random.normal(k1, (N2, Cin2, h2, w2), jnp.float32)
    skip2 = jax.random.normal(k2, (N2, Cs2, 2 * h2, 2 * w2), jnp.float32)
    weight2 = jax.random.normal(k3, (Cout2, Cin2 + Cs2, 3, 3), jnp.float32) * 0.1
    bias2 = jax.random.normal(k4, (Cout2,), jnp.float32) * 0.1
    out2 = jax.block_until_ready(decoder_block_forward(x2, skip2, weight2, bias2))
    ref2 = _reference(x2, skip2, weight2, bias2)
    assert out2.shape == (N2, Cout2, 2 * h2, 2 * w2)
    err3 = float(jnp.max(jnp.abs(out2 - ref2)))
    assert jnp.allclose(out2, ref2, atol=2e-2, rtol=2e-2), f"cfg2 err={err3}"

    print("KERNEL_OK")
</pallas_src>

<mosaic_0001>
module attributes {stable_mosaic.version = 11 : i64} {
  func.func @_decoder_kernel(%arg0: i32, %arg1: i32, %arg2: memref<1x4x8x4xbf16, #tpu.memory_space<vmem>>, %arg3: memref<1x1x8x4xbf16, #tpu.memory_space<vmem>>, %arg4: memref<1x1x8x4xbf16, #tpu.memory_space<vmem>>, %arg5: memref<1x8x8x8xbf16, #tpu.memory_space<vmem>>, %arg6: memref<1x1x8x8xbf16, #tpu.memory_space<vmem>>, %arg7: memref<1x1x8x8xbf16, #tpu.memory_space<vmem>>, %arg8: memref<3x32x128xbf16, #tpu.memory_space<vmem>>, %arg9: memref<1x128xf32, #tpu.memory_space<vmem>>, %arg10: memref<1x8x8x128xf32, #tpu.memory_space<vmem>>) attributes {dimension_semantics = [#tpu.dimension_semantics<parallel>, #tpu.dimension_semantics<parallel>], iteration_bounds = array<i64: 2, 2>, scalar_prefetch = 0 : i64, scratch_operands = 0 : i64, tpu.core_type = #tpu.core_type<tc>, window_params = [{transform_indices = @transform_0, window_bounds = array<i64: 1, 4, 8, 4>}, {transform_indices = @transform_1, window_bounds = array<i64: 1, 1, 8, 4>}, {transform_indices = @transform_2, window_bounds = array<i64: 1, 1, 8, 4>}, {transform_indices = @transform_3, window_bounds = array<i64: 1, 8, 8, 8>}, {transform_indices = @transform_4, window_bounds = array<i64: 1, 1, 8, 8>}, {transform_indices = @transform_5, window_bounds = array<i64: 1, 1, 8, 8>}, {pipeline_mode = #tpu.pipeline_mode<synchronous>, transform_indices = @transform_6, window_bounds = array<i64: 3, 32, 128>}, {pipeline_mode = #tpu.pipeline_mode<synchronous>, transform_indices = @transform_7, window_bounds = array<i64: 1, 128>}, {transform_indices = @transform_8, window_bounds = array<i64: 1, 8, 8, 128>}]} {
    %c0 = arith.constant 0 : index
    %c0_0 = arith.constant 0 : index
    %c0_1 = arith.constant 0 : index
    %c0_2 = arith.constant 0 : index
    %0 = vector.load %arg3[%c0, %c0_0, %c0_1, %c0_2] : memref<1x1x8x4xbf16, #tpu.memory_space<vmem>>, vector<1x1x8x4xbf16>
    %1 = vector.shape_cast %0 : vector<1x1x8x4xbf16> to vector<1x8x4xbf16>
    %c0_3 = arith.constant 0 : index
    %c0_4 = arith.constant 0 : index
    %c0_5 = arith.constant 0 : index
    %c0_6 = arith.constant 0 : index
    %2 = vector.load %arg2[%c0_3, %c0_4, %c0_5, %c0_6] : memref<1x4x8x4xbf16, #tpu.memory_space<vmem>>, vector<1x4x8x4xbf16>
    %3 = vector.shape_cast %2 : vector<1x4x8x4xbf16> to vector<4x8x4xbf16>
    %c0_7 = arith.constant 0 : index
    %c0_8 = arith.constant 0 : index
    %c0_9 = arith.constant 0 : index
    %c0_10 = arith.constant 0 : index
    %4 = vector.load %arg4[%c0_7, %c0_8, %c0_9, %c0_10] : memref<1x1x8x4xbf16, #tpu.memory_space<vmem>>, vector<1x1x8x4xbf16>
    %5 = vector.shape_cast %4 : vector<1x1x8x4xbf16> to vector<1x8x4xbf16>
    %6 = tpu.concatenate %1, %3, %5 in 0 : vector<1x8x4xbf16>, vector<4x8x4xbf16>, vector<1x8x4xbf16> -> vector<6x8x4xbf16>
    %7 = arith.extf %6 : vector<6x8x4xbf16> to vector<6x8x4xf32>
    %8 = vector.extract_strided_slice %7 {offsets = [0, 0, 0], sizes = [5, 8, 4], strides = [1, 1, 1]} : vector<6x8x4xf32> to vector<5x8x4xf32>
    %9 = vector.extract_strided_slice %7 {offsets = [1, 0, 0], sizes = [5, 8, 4], strides = [1, 1, 1]} : vector<6x8x4xf32> to vector<5x8x4xf32>
    %cst = arith.constant 7.500000e-01 : f32
    %10 = vector.broadcast %cst : f32 to vector<5x8x4xf32>
    %11 = arith.mulf %10, %8 : vector<5x8x4xf32>
    %cst_11 = arith.constant 2.500000e-01 : f32
    %12 = vector.broadcast %cst_11 : f32 to vector<5x8x4xf32>
    %13 = arith.mulf %12, %9 : vector<5x8x4xf32>
    %14 = arith.addf %11, %13 : vector<5x8x4xf32>
    %cst_12 = arith.constant 2.500000e-01 : f32
    %15 = vector.broadcast %cst_12 : f32 to vector<5x8x4xf32>
    %16 = arith.mulf %15, %8 : vector<5x8x4xf32>
    %cst_13 = arith.constant 7.500000e-01 : f32
    %17 = vector.broadcast %cst_13 : f32 to vector<5x8x4xf32>
    %18 = arith.mulf %17, %9 : vector<5x8x4xf32>
    %19 = arith.addf %16, %18 : vector<5x8x4xf32>
    %20 = vector.shape_cast %14 : vector<5x8x4xf32> to vector<5x1x8x4xf32>
    %21 = vector.shape_cast %19 : vector<5x8x4xf32> to vector<5x1x8x4xf32>
    %22 = tpu.concatenate %20, %21 in 1 : vector<5x1x8x4xf32>, vector<5x1x8x4xf32> -> vector<5x2x8x4xf32>
    %23 = vector.shape_cast %22 : vector<5x2x8x4xf32> to vector<10x8x4xf32>
    %24 = tpu.iota {dimensions = array<i32: 0>} : vector<10x1x1xi32>
    %c0_i32 = arith.constant 0 : i32
    %25 = arith.cmpi eq, %arg1, %c0_i32 : i32
    %c0_i32_14 = arith.constant 0 : i32
    %26 = vector.broadcast %c0_i32_14 : i32 to vector<10x1x1xi32>
    %27 = arith.cmpi eq, %24, %26 : vector<10x1x1xi32>
    %28 = vector.broadcast %25 : i1 to vector<10x1x1xi1>
    %29 = arith.andi %28, %27 : vector<10x1x1xi1>
    %c1_i32 = arith.constant 1 : i32
    %30 = arith.cmpi eq, %arg1, %c1_i32 : i32
    %c9_i32 = arith.constant 9 : i32
    %31 = vector.broadcast %c9_i32 : i32 to vector<10x1x1xi32>
    %32 = arith.cmpi eq, %24, %31 : vector<10x1x1xi32>
    %33 = vector.broadcast %30 : i1 to vector<10x1x1xi1>
    %34 = arith.andi %33, %32 : vector<10x1x1xi1>
    %35 = arith.ori %29, %34 : vector<10x1x1xi1>
    %cst_15 = arith.constant 0.000000e+00 : f32
    %36 = vector.shape_cast %35 : vector<10x1x1xi1> to vector<10x1x1xi1>
    %37 = vector.broadcast %36 : vector<10x1x1xi1> to vector<10x8x4xi1>
    %38 = vector.broadcast %cst_15 : f32 to vector<10x8x4xf32>
    %39 = arith.select %37, %38, %23 : vector<10x8x4xi1>, vector<10x8x4xf32>
    %40 = vector.extract_strided_slice %39 {offsets = [0, 0, 0], sizes = [10, 1, 4], strides = [1, 1, 1]} : vector<10x8x4xf32> to vector<10x1x4xf32>
    %41 = vector.extract_strided_slice %39 {offsets = [0, 0, 0], sizes = [10, 7, 4], strides = [1, 1, 1]} : vector<10x8x4xf32> to vector<10x7x4xf32>
    %42 = tpu.concatenate %40, %41 in 1 : vector<10x1x4xf32>, vector<10x7x4xf32> -> vector<10x8x4xf32>
    %43 = vector.extract_strided_slice %39 {offsets = [0, 1, 0], sizes = [10, 7, 4], strides = [1, 1, 1]} : vector<10x8x4xf32> to vector<10x7x4xf32>
    %44 = vector.extract_strided_slice %39 {offsets = [0, 7, 0], sizes = [10, 1, 4], strides = [1, 1, 1]} : vector<10x8x4xf32> to vector<10x1x4xf32>
    %45 = tpu.concatenate %43, %44 in 1 : vector<10x7x4xf32>, vector<10x1x4xf32> -> vector<10x8x4xf32>
    %cst_16 = arith.constant 2.500000e-01 : f32
    %46 = vector.broadcast %cst_16 : f32 to vector<10x8x4xf32>
    %47 = arith.mulf %46, %42 : vector<10x8x4xf32>
    %cst_17 = arith.constant 7.500000e-01 : f32
    %48 = vector.broadcast %cst_17 : f32 to vector<10x8x4xf32>
    %49 = arith.mulf %48, %39 : vector<10x8x4xf32>
    %50 = arith.addf %47, %49 : vector<10x8x4xf32>
    %51 = arith.truncf %50 : vector<10x8x4xf32> to vector<10x8x4xbf16>
    %cst_18 = arith.constant 7.500000e-01 : f32
    %52 = vector.broadcast %cst_18 : f32 to vector<10x8x4xf32>
    %53 = arith.mulf %52, %39 : vector<10x8x4xf32>
    %cst_19 = arith.constant 2.500000e-01 : f32
    %54 = vector.broadcast %cst_19 : f32 to vector<10x8x4xf32>
    %55 = arith.mulf %54, %45 : vector<10x8x4xf32>
    %56 = arith.addf %53, %55 : vector<10x8x4xf32>
    %57 = arith.truncf %56 : vector<10x8x4xf32> to vector<10x8x4xbf16>
    %c0_20 = arith.constant 0 : index
    %c0_21 = arith.constant 0 : index
    %c0_22 = arith.constant 0 : index
    %c0_23 = arith.constant 0 : index
    %58 = vector.load %arg6[%c0_20, %c0_21, %c0_22, %c0_23] : memref<1x1x8x8xbf16, #tpu.memory_space<vmem>>, vector<1x1x8x8xbf16>
    %59 = vector.shape_cast %58 : vector<1x1x8x8xbf16> to vector<1x8x8xbf16>
    %c0_24 = arith.constant 0 : index
    %c0_25 = arith.constant 0 : index
    %c0_26 = arith.constant 0 : index
    %c0_27 = arith.constant 0 : index
    %60 = vector.load %arg5[%c0_24, %c0_25, %c0_26, %c0_27] : memref<1x8x8x8xbf16, #tpu.memory_space<vmem>>, vector<1x8x8x8xbf16>
    %61 = vector.shape_cast %60 : vector<1x8x8x8xbf16> to vector<8x8x8xbf16>
    %c0_28 = arith.constant 0 : index
    %c0_29 = arith.constant 0 : index
    %c0_30 = arith.constant 0 : index
    %c0_31 = arith.constant 0 : index
    %62 = vector.load %arg7[%c0_28, %c0_29, %c0_30, %c0_31] : memref<1x1x8x8xbf16, #tpu.memory_space<vmem>>, vector<1x1x8x8xbf16>
    %63 = vector.shape_cast %62 : vector<1x1x8x8xbf16> to vector<1x8x8xbf16>
    %64 = tpu.concatenate %59, %61, %63 in 0 : vector<1x8x8xbf16>, vector<8x8x8xbf16>, vector<1x8x8xbf16> -> vector<10x8x8xbf16>
    %cst_32 = arith.constant 0.000000e+00 : bf16
    %65 = vector.shape_cast %35 : vector<10x1x1xi1> to vector<10x1x1xi1>
    %66 = vector.broadcast %65 : vector<10x1x1xi1> to vector<10x8x8xi1>
    %67 = vector.broadcast %cst_32 : bf16 to vector<10x8x8xbf16>
    %68 = arith.select %66, %67, %64 : vector<10x8x8xi1>, vector<10x8x8xbf16>
    %69 = vector.extract_strided_slice %68 {offsets = [0, 0, 0], sizes = [10, 8, 4], strides = [1, 1, 1]} : vector<10x8x8xbf16> to vector<10x8x4xbf16>
    %70 = vector.extract_strided_slice %68 {offsets = [0, 0, 4], sizes = [10, 8, 4], strides = [1, 1, 1]} : vector<10x8x8xbf16> to vector<10x8x4xbf16>
    %71 = tpu.concatenate %51, %69 in 2 : vector<10x8x4xbf16>, vector<10x8x4xbf16> -> vector<10x8x8xbf16>
    %72 = tpu.concatenate %57, %70 in 2 : vector<10x8x4xbf16>, vector<10x8x4xbf16> -> vector<10x8x8xbf16>
    %cst_33 = arith.constant 0.000000e+00 : bf16
    %73 = vector.broadcast %cst_33 : bf16 to vector<10x1x8xbf16>
    %74 = vector.extract_strided_slice %72 {offsets = [0, 0, 0], sizes = [10, 7, 8], strides = [1, 1, 1]} : vector<10x8x8xbf16> to vector<10x7x8xbf16>
    %75 = tpu.concatenate %73, %74 in 1 : vector<10x1x8xbf16>, vector<10x7x8xbf16> -> vector<10x8x8xbf16>
    %76 = vector.extract_strided_slice %71 {offsets = [0, 1, 0], sizes = [10, 7, 8], strides = [1, 1, 1]} : vector<10x8x8xbf16> to vector<10x7x8xbf16>
    %77 = tpu.concatenate %76, %73 in 1 : vector<10x7x8xbf16>, vector<10x1x8xbf16> -> vector<10x8x8xbf16>
    %78 = tpu.concatenate %75, %71, %72, %77 in 2 : vector<10x8x8xbf16>, vector<10x8x8xbf16>, vector<10x8x8xbf16>, vector<10x8x8xbf16> -> vector<10x8x32xbf16>
    %79 = vector.extract_strided_slice %78 {offsets = [0, 0, 0], sizes = [8, 8, 32], strides = [1, 1, 1]} : vector<10x8x32xbf16> to vector<8x8x32xbf16>
    %80 = vector.shape_cast %79 : vector<8x8x32xbf16> to vector<64x32xbf16>
    %c0_34 = arith.constant 0 : index
    %c0_35 = arith.constant 0 : index
    %c0_36 = arith.constant 0 : index
    %81 = vector.load %arg8[%c0_34, %c0_35, %c0_36] : memref<3x32x128xbf16, #tpu.memory_space<vmem>>, vector<1x32x128xbf16>
    %82 = vector.shape_cast %81 : vector<1x32x128xbf16> to vector<32x128xbf16>
    %cst_37 = arith.constant dense<0.000000e+00> : vector<64x128xf32>
    %83 = tpu.matmul %80, %82, %cst_37 {dimension_numbers = #tpu.dot_dimension_numbers<[1], [0], [0], [1], [0, 0, 1, 1], [], []>} : vector<64x32xbf16>, vector<32x128xbf16>, vector<64x128xf32> -> vector<64x128xf32>
    %84 = vector.extract_strided_slice %78 {offsets = [1, 0, 0], sizes = [8, 8, 32], strides = [1, 1, 1]} : vector<10x8x32xbf16> to vector<8x8x32xbf16>
    %85 = vector.shape_cast %84 : vector<8x8x32xbf16> to vector<64x32xbf16>
    %c1 = arith.constant 1 : index
    %c0_38 = arith.constant 0 : index
    %c0_39 = arith.constant 0 : index
    %86 = vector.load %arg8[%c1, %c0_38, %c0_39] : memref<3x32x128xbf16, #tpu.memory_space<vmem>>, vector<1x32x128xbf16>
    %87 = vector.shape_cast %86 : vector<1x32x128xbf16> to vector<32x128xbf16>
    %cst_40 = arith.constant dense<0.000000e+00> : vector<64x128xf32>
    %88 = tpu.matmul %85, %87, %cst_40 {dimension_numbers = #tpu.dot_dimension_numbers<[1], [0], [0], [1], [0, 0, 1, 1], [], []>} : vector<64x32xbf16>, vector<32x128xbf16>, vector<64x128xf32> -> vector<64x128xf32>
    %89 = arith.addf %83, %88 : vector<64x128xf32>
    %90 = vector.extract_strided_slice %78 {offsets = [2, 0, 0], sizes = [8, 8, 32], strides = [1, 1, 1]} : vector<10x8x32xbf16> to vector<8x8x32xbf16>
    %91 = vector.shape_cast %90 : vector<8x8x32xbf16> to vector<64x32xbf16>
    %c2 = arith.constant 2 : index
    %c0_41 = arith.constant 0 : index
    %c0_42 = arith.constant 0 : index
    %92 = vector.load %arg8[%c2, %c0_41, %c0_42] : memref<3x32x128xbf16, #tpu.memory_space<vmem>>, vector<1x32x128xbf16>
    %93 = vector.shape_cast %92 : vector<1x32x128xbf16> to vector<32x128xbf16>
    %cst_43 = arith.constant dense<0.000000e+00> : vector<64x128xf32>
    %94 = tpu.matmul %91, %93, %cst_43 {dimension_numbers = #tpu.dot_dimension_numbers<[1], [0], [0], [1], [0, 0, 1, 1], [], []>} : vector<64x32xbf16>, vector<32x128xbf16>, vector<64x128xf32> -> vector<64x128xf32>
    %95 = arith.addf %89, %94 : vector<64x128xf32>
    %c0_44 = arith.constant 0 : index
    %c0_45 = arith.constant 0 : index
    %96 = vector.load %arg9[%c0_44, %c0_45] : memref<1x128xf32, #tpu.memory_space<vmem>>, vector<1x128xf32>
    %97 = vector.broadcast %96 : vector<1x128xf32> to vector<64x128xf32>
    %98 = arith.addf %95, %97 : vector<64x128xf32>
    %cst_46 = arith.constant 0.000000e+00 : f32
    %99 = vector.broadcast %cst_46 : f32 to vector<64x128xf32>
    %100 = arith.maximumf %98, %99 : vector<64x128xf32>
    %101 = vector.shape_cast %100 : vector<64x128xf32> to vector<8x8x128xf32>
    %c0_47 = arith.constant 0 : index
    %c0_48 = arith.constant 0 : index
    %c0_49 = arith.constant 0 : index
    %c0_50 = arith.constant 0 : index
    %102 = vector.load %arg10[%c0_47, %c0_48, %c0_49, %c0_50] : memref<1x8x8x128xf32, #tpu.memory_space<vmem>>, vector<1x8x8x128xf32>
    %103 = vector.shape_cast %102 : vector<1x8x8x128xf32> to vector<8x8x128xf32>
    %104 = vector.shape_cast %101 : vector<8x8x128xf32> to vector<1x8x8x128xf32>
    tpu.vector_store %arg10[%c0_47, %c0_48, %c0_49, %c0_50], %104 {strides = array<i32>} : memref<1x8x8x128xf32, #tpu.memory_space<vmem>>, vector<1x8x8x128xf32>,
    return
  }
  func.func @transform_0(%arg0: i32, %arg1: i32) -> (i32, i32, i32, i32) {
    %c0_i32 = arith.constant 0 : i32
    %c0_i32_0 = arith.constant 0 : i32
    %c0_i32_1 = arith.constant 0 : i32
    return %arg0, %arg1, %c0_i32, %c0_i32_0 : i32, i32, i32, i32
  }
  func.func @transform_1(%arg0: i32, %arg1: i32) -> (i32, i32, i32, i32) {
    %c4_i32 = arith.constant 4 : i32
    %0 = arith.muli %arg1, %c4_i32 : i32
    %c1_i32 = arith.constant 1 : i32
    %1 = arith.subi %0, %c1_i32 : i32
    %c0_i32 = arith.constant 0 : i32
    %2 = arith.maxsi %1, %c0_i32 : i32
    %c0_i32_0 = arith.constant 0 : i32
    %c0_i32_1 = arith.constant 0 : i32
    %c0_i32_2 = arith.constant 0 : i32
    return %arg0, %2, %c0_i32_0, %c0_i32_1 : i32, i32, i32, i32
  }
  func.func @transform_2(%arg0: i32, %arg1: i32) -> (i32, i32, i32, i32) {
    %c4_i32 = arith.constant 4 : i32
    %0 = arith.muli %arg1, %c4_i32 : i32
    %c4_i32_0 = arith.constant 4 : i32
    %1 = arith.addi %0, %c4_i32_0 : i32
    %c7_i32 = arith.constant 7 : i32
    %2 = arith.minsi %1, %c7_i32 : i32
    %c0_i32 = arith.constant 0 : i32
    %c0_i32_1 = arith.constant 0 : i32
    %c0_i32_2 = arith.constant 0 : i32
    return %arg0, %2, %c0_i32, %c0_i32_1 : i32, i32, i32, i32
  }
  func.func @transform_3(%arg0: i32, %arg1: i32) -> (i32, i32, i32, i32) {
    %c0_i32 = arith.constant 0 : i32
    %c0_i32_0 = arith.constant 0 : i32
    %c0_i32_1 = arith.constant 0 : i32
    return %arg0, %arg1, %c0_i32, %c0_i32_0 : i32, i32, i32, i32
  }
  func.func @transform_4(%arg0: i32, %arg1: i32) -> (i32, i32, i32, i32) {
    %c8_i32 = arith.constant 8 : i32
    %0 = arith.muli %arg1, %c8_i32 : i32
    %c1_i32 = arith.constant 1 : i32
    %1 = arith.subi %0, %c1_i32 : i32
    %c0_i32 = arith.constant 0 : i32
    %2 = arith.maxsi %1, %c0_i32 : i32
    %c0_i32_0 = arith.constant 0 : i32
    %c0_i32_1 = arith.constant 0 : i32
    %c0_i32_2 = arith.constant 0 : i32
    return %arg0, %2, %c0_i32_0, %c0_i32_1 : i32, i32, i32, i32
  }
  func.func @transform_5(%arg0: i32, %arg1: i32) -> (i32, i32, i32, i32) {
    %c8_i32 = arith.constant 8 : i32
    %0 = arith.muli %arg1, %c8_i32 : i32
    %c8_i32_0 = arith.constant 8 : i32
    %1 = arith.addi %0, %c8_i32_0 : i32
    %c15_i32 = arith.constant 15 : i32
    %2 = arith.minsi %1, %c15_i32 : i32
    %c0_i32 = arith.constant 0 : i32
    %c0_i32_1 = arith.constant 0 : i32
    %c0_i32_2 = arith.constant 0 : i32
    return %arg0, %2, %c0_i32, %c0_i32_1 : i32, i32, i32, i32
  }
  func.func @transform_6(%arg0: i32, %arg1: i32) -> (i32, i32, i32) {
    %c0_i32 = arith.constant 0 : i32
    %c0_i32_0 = arith.constant 0 : i32
    %c0_i32_1 = arith.constant 0 : i32
    %c0_i32_2 = arith.constant 0 : i32
    return %c0_i32, %c0_i32_0, %c0_i32_1 : i32, i32, i32
  }
  func.func @transform_7(%arg0: i32, %arg1: i32) -> (i32, i32) {
    %c0_i32 = arith.constant 0 : i32
    %c0_i32_0 = arith.constant 0 : i32
    %c0_i32_1 = arith.constant 0 : i32
    return %c0_i32, %c0_i32_0 : i32, i32
  }
  func.func @transform_8(%arg0: i32, %arg1: i32) -> (i32, i32, i32, i32) {
    %c0_i32 = arith.constant 0 : i32
    %c0_i32_0 = arith.constant 0 : i32
    %c0_i32_1 = arith.constant 0 : i32
    return %arg0, %arg1, %c0_i32, %c0_i32_0 : i32, i32, i32, i32
  }
}

</mosaic_0001>

<bundles_post_ra>
// kernel: decoder_block_forward.1
= control target key start
LH: loop header
LB: loop body
LE: loop exit
PB: predicated region body
PF: predicated region fallthrough
CT: control target
= control target key end

     0   :  { %s2135_s27 = smov 0   ;;  %s2137_s28 = smov 0   ;;  %s2814_s0 = inlined_call_operand.vmem [shape: bf16[2,8,8,4], index: 0, kind: input, shape index: {}, may-alias: {0,1,2}]   ;;  %s2815_s1 = inlined_call_operand.vmem [shape: bf16[2,8,8,4], index: 1, kind: input, shape index: {}, may-alias: {0,1,2}]   ;;  %s2816_s2 = inlined_call_operand.vmem [shape: bf16[2,8,8,4], index: 2, kind: input, shape index: {}, may-alias: {0,1,2}]   ;;  %s2817_s3 = inlined_call_operand.vmem [shape: bf16[2,16,8,8], index: 3, kind: input, shape index: {}, may-alias: {3,4,5}]   ;;  %s2818_s4 = inlined_call_operand.vmem [shape: bf16[2,16,8,8], index: 4, kind: input, shape index: {}, may-alias: {3,4,5}]   ;;  %s2819_s5 = inlined_call_operand.vmem [shape: bf16[2,16,8,8], index: 5, kind: input, shape index: {}, may-alias: {3,4,5}]   ;;  %s2820_s6 = inlined_call_operand.vmem [shape: bf16[3,32,128], index: 6, kind: input, shape index: {}]   ;;  %s2821_s7 = inlined_call_operand.vmem [shape: f32[1,128], index: 7, kind: input, shape index: {}]   ;;  %s2822_s8 = inlined_call_operand.vmem [shape: f32[2,16,8,128], index: 8, kind: output, shape index: {}]  }
   0x1   :  { %s2139_s29 = smov 0   ;;  %s2141_s30 = smov 0  }
   0x2   :  { %s2143_s9 = smov 0  }
   0x3 LB: > { %s27_s10 = sadd.s32 1, %s2076_s29  ;;  %s30_s11 = sadd.s32 1, %s2080_s30  ;;  %s2084_s9 = sphi %s2143_s9, %s18_s9   ;;  %s2080_s30 = sphi %s2141_s30, %s2836_s30   ;;  %s2076_s29 = sphi %s2139_s29, %s2835_s29   ;;  %s2072_s28 = sphi %s2137_s28, %s2834_s28   ;;  %s2068_s27 = sphi %s2135_s27, %s2833_s27  }
   0x4   : > { %p28_p0 = scmp.ge.s32.totalorder %s27_s10, 2  ;;  %p1813_p1 = scmp.ge.s32.totalorder %s2084_s9, 1 }
   0x5   : > { %p424_p2 = scmp.lt.s32.totalorder %s2084_s9, 5 }
   0x6   : > { %s2838_s10 = smov (%p28_p0, %s27_s10), 0  ;;  %s2840_s11 = smov (!%p28_p0, %s30_s11), %s2080_s30 }
   0x7   : > { %p425_p3 = pnand %p1813_p1, %p424_p2  ;;  %p32_p4 = scmp.ge.s32.totalorder %s2840_s11, 2 }
   0x8   : > { %p524_p5 = scmp.lt.s32.totalorder (!%p425_p3), %s2072_s28, 1  ;;  %s2168_s12 = sshll.u32 (!%p425_p3), %s2068_s27, 3  ;;  %vm735_vm1 = vcmask (!%p425_p3), 1046528   ;;  %vm886_vm2 = vcmask (!%p425_p3), 31744   ;;  %vm704_vm4 = vcmask (!%p425_p3), 1040384   ;;  %vm1100_vm7 = vcmask (!%p425_p3), 1043456  }
   0x9   : > { %s2842_s11 = smov (%p32_p4, %s2840_s11), 0  ;;  %428 = sbr.rel (%p425_p3) target bundleno = 538 (0x21a), region = 52 }
   0xa   : > { %p568_p6 = scmp.lt.s32.totalorder (!%p425_p3), %s2168_s12, 15  ;;  %s1836_s15 = sadd.s32 (!%p425_p3), 4294967295, %s2168_s12  ;;  %vm1018_vm5 = vsmask.f32 (!%p425_p3), 256  ;;  %vm1101_vm8 = vsmask.f32 (!%p425_p3), 3328 }
   0xb   : > { %p577_p7 = scmp.gt.s32.totalorder (!%p425_p3), %s1836_s15, 0  ;;  %p1837_p8 = scmp.lt.s32.totalorder (!%p425_p3), %s1836_s15, 15  ;;  %vm2494_vm6 = vmand (!%p425_p3), %vm704_vm4, %vm1018_vm5  ;;  %vm1203_vm10 = vcmask (!%p425_p3), 64512   ;;  %vm1234_vm11 = vcmask (!%p425_p3), 130048   ;;  %vm1255_vm12 = vcmask (!%p425_p3), 195584   ;;  %vm1317_vm13 = vcmask (!%p425_p3), 261120  }
   0xc   : > { %p652_p9 = scmp.eq.s32.totalorder (!%p425_p3), %s2068_s27, 0  ;;  %s2199_s21 = sshll.u32 (!%p425_p3), %s2068_s27, 2  ;;  %vm2596_vm9 = vmand (!%p425_p3), %vm1100_vm7, %vm1101_vm8 }
   0xd   : > { %s2086_s22 = smov (!%p425_p3), 4   ;;  %p526_p10 = scmp.lt.s32.totalorder (!%p425_p3), %s2199_s21, 7 }
   0xe   : > { %s1818_s19 = sadd.s32 (!%p425_p3), 4294967295, %s2199_s21  ;;  %p656_p0 = scmp.eq.s32.totalorder (!%p425_p3), %s2068_s27, 1 }
   0xf   : > { %p535_p11 = scmp.gt.s32.totalorder (!%p425_p3), %s1818_s19, 0  ;;  %p1819_p12 = scmp.lt.s32.totalorder (!%p425_p3), %s1818_s19, 7 }
  0x10   : > { %s2844_s28 = smov (!%p524_p5, %s2072_s28), 1  ;;  %s2846_s15 = smov (!%p577_p7, %s1836_s15), 0 }
  0x11   : > { %s569_s13 = scalar_select %p568_p6, %s2168_s12, 15 }
  0x12   : > { %s2172_s14 = sshll.u32 %s2844_s28, 4  ;;  %s2848_s15 = smov (!%p1837_p8, %s2846_s15), 15 }
  0x13   : > { %s2176_s16 = sadd.s32 %s2172_s14, %s569_s13  ;;  %s584_s24 = sadd.s32 %s2848_s15, %s2172_s14 }
  0x14   : > { %s1834_s17 = sshll.u32 %s2176_s16, 2  ;;  %s1843_s25 = sshll.u32 %s584_s24, 2 }
  0x15   : > { %s2182_s20 = scalar_lea.vmem %s2817_s3, %s1834_s17  ;;  %s2210_s26 = sshll.u32 %s2844_s28, 3 }
  0x16   : > { %v2185_v0 = vld [vmem:[%s2182_s20 + $0x4] sm:$0xf]  ;;  %v2188_v1 = vld [vmem:[%s2182_s20] sm:$0xf]  ;;  %v2191_v2 = vld [vmem:[%s2182_s20 + $0x8] sm:$0xf]  ;;  %s586_s18 = scalar_lea.vmem %s2818_s4, %s1843_s25 }
  0x17   : > { %v1855_v3 = vcombine.low %v2185_v0, %v2185_v0  ;;  %v1854_v4 = vcombine.low %v2188_v1, %v2188_v1  ;;  %v1856_v5 = vcombine.low %v2191_v2, %v2191_v2  ;;  %s653_s23 = scalar_select %p652_p9, 1, 0  ;;  %v2206_v6 = vld [vmem:[%s2182_s20 + $0x10] sm:$0xf]  ;;  %v816_v10 = vld [vmem:[%s586_s18] sm:$0xf] }
  0x18   : > { %v1858_v9 = vcombine.low %v2206_v6, %v2206_v6  ;;  %s527_s15 = scalar_select %p526_p10, %s2199_s21, 7  ;;  %v2225_v11 = vld [vmem:[%s2182_s20 + $0x18] sm:$0xf]  ;;  %v2232_v13 = vld [vmem:[%s2182_s20 + $0xc] sm:$0xf] }
  0x19   : > { %870 = vrot.lane.b32.xlu1 %v1855_v3, %s2086_s22  ;;  %868 = vrot.lane.b32.xlu0 %v1854_v4, %s2086_s22  ;;  %v654_v7 = vstv %s653_s23  ;;  %s592_s23 = sadd.s32 8, %s2168_s12  ;;  %v1860_v15 = vcombine.low %v2225_v11, %v2225_v11  ;;  %v1857_v16 = vcombine.low %v2232_v13, %v2232_v13  ;;  %v2252_v17 = vld [vmem:[%s2182_s20 + $0x14] sm:$0xf] }
  0x1a   : > { %vm2216_vm0 = vcmp.eq.s32.totalorder %v654_v7, 1  ;;  %s529_s28 = sadd.s32 %s2210_s26, %s527_s15  ;;  %p2241_p13 = scmp.lt.s32.totalorder %s592_s23, 15  ;;  %v1859_v23 = vcombine.low %v2252_v17, %v2252_v17  ;;  %v2270_v28 = vld [vmem:[%s2182_s20 + $0x1c] sm:$0xf] }
  0x1b   : > { %v2229_v12 = vsel %vm2216_vm0, 0, %v816_v10  ;;  %s1816_s24 = sshll.u32 %s529_s28, 2  ;;  %s550_s28 = sadd.s32 4, %s2199_s21  ;;  %v1861_v36 = vcombine.low %v2270_v28, %v2270_v28 }
  0x1c   : > { %v1853_v14 = vcombine.low %v2229_v12, %v2229_v12  ;;  %s531_s18 = scalar_lea.vmem %s2814_s0, %s1816_s24  ;;  %s2850_s23 = smov (!%p2241_p13, %s592_s23), 15 }
  0x1d   : > { %872 = vrot.lane.b32.xlu1 %v1856_v5, %s2086_s22  ;;  %s536_s12 = scalar_select %p535_p11, %s1818_s19, 0  ;;  %v1906_v18 = vld [vmem:[%s531_s18] sm:$0xff]   ;;  %v2256_v19 = vld [vmem:[%s531_s18 + $0x8] sm:$0xff]  }
  0x1e   : > { %866 = vrot.lane.b32.xlu0 %v1853_v14, %s2086_s22  ;;  %v1907_v20 = vunpack.c.l.bf16 %v1906_v18  ;;  %v1908_v21 = vunpack.c.h.bf16 %v1906_v18  ;;  %v1911_v22 = vunpack.c.l.bf16 %v2256_v19  ;;  %s2854_s23 = smov (!%p2241_p13, %s2850_s23), 15  ;;  %p2297_p1 = scmp.lt.s32.totalorder %s550_s28, 7  ;;  %v1912_v40 = vunpack.c.h.bf16 %v2256_v19 }
  0x1f   : > { %s2852_s12 = smov (!%p1819_p12, %s536_s12), 7  ;;  %s600_s24 = sadd.s32 %s2172_s14, %s2854_s23 }
  0x20   : > { %v631_v24 = vmul.f32 0.75, %v1907_v20  ;;  %v632_v25 = vmul.f32 0.75, %v1908_v21  ;;  %v635_v26 = vmul.f32 0.25, %v1907_v20  ;;  %v636_v27 = vmul.f32 0.25, %v1908_v21  ;;  %s542_s15 = sadd.s32 %s2852_s12, %s2210_s26  ;;  %s1849_s18 = sshll.u32 %s600_s24, 2 }
  0x21   : > { %876 = vrot.lane.b32.xlu1 %v1858_v9, %s2086_s22  ;;  %v2273_v29 = vmul.f32 0.75, %v1911_v22  ;;  %v2275_v30 = vmul.f32 0.25, %v1911_v22  ;;  %s1825_s19 = sshll.u32 %s542_s15, 2  ;;  %s602_s21 = scalar_lea.vmem %s2819_s5, %s1849_s18  ;;  %v638_v4 = vmul.f32 0.25, %v1912_v40  ;;  %v634_v21 = vmul.f32 0.75, %v1912_v40 }
  0x22   : > { %874 = vrot.lane.b32.xlu0 %v1857_v16, %s2086_s22  ;;  %v2277_v31 = vadd.f32 %v636_v27, %v631_v24  ;;  %v2279_v32 = vadd.f32 %v635_v26, %v632_v25  ;;  %s544_s25 = scalar_lea.vmem %s2815_s1, %s1825_s19  ;;  %v825_v43 = vld [vmem:[%s602_s21] sm:$0xf]  ;;  %s2856_s28 = smov (!%p2297_p1, %s550_s28), 7 }
  0x23   : > { %v2286_v33 = vadd.f32 %v2275_v30, %v632_v25  ;;  %v2289_v34 = vadd.f32 %v636_v27, %v2273_v29  ;;  %v618_v35 = vld [vmem:[%s544_s25] sm:$0xf]  ;;  %s657_s12 = scalar_select %p656_p0, 1, 0 }
  0x24   : > { %v717_v37 = vrot.slane %v2277_v31, 1  ;;  %v718_v38 = vrot.slane %v2279_v32, 1  ;;  %v624_v39 = vunpack.c.l.bf16 %v618_v35  ;;  %v2307_v41 = vmul.f32 0.75, %v2277_v31  ;;  %s2858_s28 = smov (!%p2297_p1, %s2856_s28), 7  ;;  %s2088_s24 = smov 8  }
  0x25   : > { %880 = vrot.lane.b32.xlu1 %v1860_v15, %s2086_s22  ;;  %v719_v42 = vrot.slane %v2286_v33, 1  ;;  %v2317_v46 = vmul.f32 0.75, %v2279_v32  ;;  %v720_v47 = vrot.slane %v2289_v34, 1  ;;  %v658_v50 = vstv %s657_s12  ;;  %s558_s27 = sadd.s32 %s2210_s26, %s2858_s28  ;;  %s2089_s25 = smov 24  }
  0x26   : > { %878 = vrot.lane.b32.xlu0 %v1859_v23, %s2086_s22  ;;  %v738_v44 = vsel %vm735_vm1, %v717_v37, %v2277_v31  ;;  %v739_v45 = vsel %vm735_vm1, %v718_v38, %v2279_v32  ;;  %v630_v48 = vmul.f32 0.75, %v624_v39  ;;  %v645_v49 = vmul.f32 0.25, %v624_v39  ;;  %s1831_s15 = sshll.u32 %s558_s27, 2 }
  0x27   : > { %v788_v51 = vmul.f32 0.25, %v738_v44  ;;  %vm2321_vm3 = vcmp.eq.s32.totalorder %v658_v50, 1  ;;  %v740_v53 = vsel %vm735_vm1, %v719_v42, %v2286_v33  ;;  %v2330_v54 = vmul.f32 0.75, %v2286_v33  ;;  %s560_s19 = scalar_lea.vmem %s2816_s2, %s1831_s15 }
  0x28   : > { %v789_v55 = vmul.f32 0.25, %v739_v45  ;;  %v640_v56 = vadd.f32 %v635_v26, %v630_v48  ;;  %v2332_v57 = vadd.f32 %v645_v49, %v631_v24  ;;  %v2336_v58 = vsel %vm2321_vm3, 0, %v825_v43  ;;  %v623_v15 = vld [vmem:[%s560_s19] sm:$0xf] }
  0x29   : > { %v798_v59 = vadd.f32 %v788_v51, %v2307_v41  ;;  %v1862_v60 = vcombine.low %v2336_v58, %v2336_v58  ;;  %v790_v61 = vmul.f32 0.25, %v740_v53  ;;  %v741_v63 = vsel %vm735_vm1, %v720_v47, %v2289_v34 }
  0x2a   : > { %882 = vrot.lane.b32.xlu0 %v1861_v36, %s2086_s22  ;;  %v799_v62 = vadd.f32 %v789_v55, %v2317_v46  ;;  %v2347_v3 = vsel %vm2216_vm0, 0.0, %v640_v56  ;;  %v716_v7 = vrot.slane %v2332_v57, 1  ;;  %v2363_v18 = vmul.f32 0.75, %v2289_v34 }
  0x2b   : > { %v808_v5 = vpack.c.bf16 %v798_v59, %v798_v59  ;;  %v715_v9 = vrot.slane %v2347_v3, 1  ;;  %884 = vrot.lane.b32.xlu1 %v1862_v60, %s2086_s22  ;;  %v800_v10 = vadd.f32 %v790_v61, %v2330_v54  ;;  %v791_v19 = vmul.f32 0.25, %v741_v63  ;;  %s2087_s22 = smov 16  }
  0x2c   : > { %v809_v14 = vpack.c.bf16 %v799_v62, %v799_v62  ;;  %v737_v16 = vsel %vm735_vm1, %v716_v7, %v2332_v57  ;;  %v629_v20 = vunpack.c.l.bf16 %v623_v15  ;;  %v757_v23 = vmul.f32 0.75, %v2332_v57 }
  0x2d   : > { %v2358_v8 = vsel %vm886_vm2, %v808_v5, %v2185_v0  ;;  %v810_v22 = vpack.c.bf16 %v800_v10, %v800_v10  ;;  %v2367_v24 = vadd.f32 %v638_v4, %v2273_v29  ;;  %v736_v0 = vsel %vm735_vm1, %v715_v9, %v2347_v3 }
  0x2e   : > { %v2371_v25 = vsel %vm886_vm2, %v809_v14, %v2191_v2  ;;  %v787_v26 = vmul.f32 0.25, %v737_v16  ;;  %v639_v27 = vmul.f32 0.25, %v629_v20  ;;  %v646_v35 = vmul.f32 0.75, %v629_v20 }
  0x2f   : > { %1157 = vrot.lane.b32.xlu1 %v2358_v8, %s2087_s22  ;;  %1159 = vrot.lane.b32.xlu0 %v2371_v25, %s2087_s22  ;;  %v2380_v29 = vmul.f32 0.75, %v2347_v3  ;;  %v2384_v2 = vsel %vm886_vm2, %v810_v22, %v2232_v13  ;;  %v801_v36 = vadd.f32 %v791_v19, %v2363_v18  ;;  %v786_v39 = vmul.f32 0.25, %v736_v0 }
  0x30   : > { %v2387_v37 = vadd.f32 %v639_v27, %v634_v21  ;;  %v651_v38 = vadd.f32 %v646_v35, %v638_v4  ;;  %v797_v40 = vadd.f32 %v787_v26, %v757_v23  ;;  %v650_v42 = vadd.f32 %v2275_v30, %v634_v21 }
  0x31   : > { %v721_v43 = vrot.slane %v2367_v24, 1  ;;  %v796_v13 = vadd.f32 %v786_v39, %v2380_v29  ;;  %v811_v47 = vpack.c.bf16 %v801_v36, %v801_v36  ;;  %v762_v49 = vmul.f32 0.75, %v2367_v24 }
  0x32   : > { %v2393_v44 = vsel %vm2321_vm3, 0.0, %v651_v38  ;;  %v807_v45 = vpack.c.bf16 %v797_v40, %v797_v40  ;;  %v722_v52 = vrot.slane %v650_v42, 1  ;;  %v685_v55 = vrot.slane %v2332_v57, 7 }
  0x33   : > { %1161 = vrot.lane.b32.xlu1 %v2384_v2, %s2087_s22  ;;  %v742_v48 = vsel %vm735_vm1, %v721_v43, %v2367_v24  ;;  %v806_v50 = vpack.c.bf16 %v796_v13, %v796_v13  ;;  %v2416_v56 = vsel %vm886_vm2, %v811_v47, %v2206_v6  ;;  %v763_v59 = vmul.f32 0.75, %v650_v42 }
  0x34   : > { %v2403_v30 = vsel %vm886_vm2, %v807_v45, %v2188_v1  ;;  %v792_v51 = vmul.f32 0.25, %v742_v48  ;;  %v743_v60 = vsel %vm735_vm1, %v722_v52, %v650_v42  ;;  %v706_v61 = vsel %vm704_vm4, %v2332_v57, %v685_v55 }
  0x35   : > { %1155 = vrot.lane.b32.xlu0 %v2403_v30, %s2087_s22  ;;  %v2409_v53 = vsel %vm886_vm2, %v806_v50, %v2229_v12  ;;  %v686_v62 = vrot.slane %v2277_v31, 7  ;;  %v687_v12 = vrot.slane %v2279_v32, 7  ;;  %v793_v4 = vmul.f32 0.25, %v743_v60 }
  0x36   : > { %v802_v1 = vadd.f32 %v792_v51, %v762_v49  ;;  %v747_v5 = vmul.f32 0.25, %v706_v61  ;;  %v689_v9 = vrot.slane %v2289_v34, 7  ;;  %v688_v10 = vrot.slane %v2286_v33, 7 }
  0x37   : > { %1153 = vrot.lane.b32.xlu1 %v2409_v53, %s2087_s22  ;;  %v707_v7 = vsel %vm704_vm4, %v2277_v31, %v686_v62  ;;  %v708_v6 = vsel %vm704_vm4, %v2279_v32, %v687_v12  ;;  %v803_v14 = vadd.f32 %v793_v4, %v763_v59  ;;  %v684_v22 = vrot.slane %v2347_v3, 7 }
  0x38   : > { %v812_v63 = vpack.c.bf16 %v802_v1, %v802_v1  ;;  %v2435_v15 = vadd.f32 %v757_v23, %v747_v5  ;;  %v748_v16 = vmul.f32 0.25, %v707_v7  ;;  %v749_v31 = vmul.f32 0.25, %v708_v6 }
  0x39   : > { %v710_v32 = vsel %vm704_vm4, %v2289_v34, %v689_v9  ;;  %v813_v19 = vpack.c.bf16 %v803_v14, %v803_v14  ;;  %v709_v23 = vsel %vm704_vm4, %v2286_v33, %v688_v10  ;;  %v691_v0 = vrot.slane %v650_v42, 7 }
  0x3a   : > { %v2433_v57 = vsel %vm886_vm2, %v812_v63, %v2252_v17  ;;  %v2442_v20 = vadd.f32 %v2307_v41, %v748_v16  ;;  %v751_v21 = vmul.f32 0.25, %v710_v32  ;;  %v2446_v17 = vadd.f32 %v2317_v46, %v749_v31 }
  0x3b   : > { %1163 = vrot.lane.b32.xlu1 %v2416_v56, %s2087_s22  ;;  %1165 = vrot.lane.b32.xlu0 %v2433_v57, %s2087_s22  ;;  %v2452_v26 = vsel %vm886_vm2, %v813_v19, %v2225_v11  ;;  %v750_v27 = vmul.f32 0.25, %v709_v23  ;;  %v953_v41 = vshrl.u32 %v2403_v30, 16  ;;  %v712_v46 = vsel %vm704_vm4, %v650_v42, %v691_v0 }
  0x3c   : > { %v2455_v34 = vadd.f32 %v2363_v18, %v751_v21  ;;  %v753_v33 = vmul.f32 0.25, %v712_v46  ;;  %v690_v36 = vrot.slane %v2367_v24, 7  ;;  %v724_v11 = vrot.slane %v2393_v44, 1 }
  0x3d   : > { %v2462_v35 = vadd.f32 %v2330_v54, %v750_v27  ;;  %v705_v18 = vsel %vm704_vm4, %v2347_v3, %v684_v22  ;;  %v955_v43 = vrot.slane %v953_v41, 7  ;;  %v956_v42 = vshll.u32 %v2403_v30, 16 }
  0x3e   : > { %v2468_v38 = vadd.f32 %v763_v59, %v753_v33  ;;  %v711_v39 = vsel %vm704_vm4, %v2367_v24, %v690_v36  ;;  %v746_v40 = vmul.f32 0.25, %v705_v18  ;;  %v723_v54 = vrot.slane %v2387_v37, 1 }
  0x3f   : > { %1167 = vrot.lane.b32.xlu1 %v2452_v26, %s2087_s22  ;;  %v752_v13 = vmul.f32 0.25, %v711_v39  ;;  %v745_v48 = vsel %vm735_vm1, %v724_v11, %v2393_v44  ;;  %v2484_v24 = vmul.f32 0.75, %v2387_v37  ;;  %v2487_v30 = vmul.f32 0.75, %v2393_v44 }
  0x40   : > { %v2475_v45 = vadd.f32 %v2380_v29, %v746_v40  ;;  %v744_v3 = vsel %vm735_vm1, %v723_v54, %v2387_v37  ;;  %v795_v51 = vmul.f32 0.25, %v745_v48  ;;  %v2489_v52 = vor.u32 %v956_v42, %v955_v43 }
  0x41   : > { %v2477_v47 = vadd.f32 %v762_v49, %v752_v13  ;;  %v794_v50 = vmul.f32 0.25, %v744_v3  ;;  %v959_v12 = vshrl.u32 %v2358_v8, 16  ;;  %v965_v63 = vshrl.u32 %v2371_v25, 16 }
  0x42   : > { %v805_v49 = vadd.f32 %v795_v51, %v2487_v30  ;;  %v1021_v1 = vsel %vm2494_vm6, 0, %v2489_v52  ;;  %v962_v4 = vshll.u32 %v2358_v8, 16  ;;  %v968_v6 = vshll.u32 %v2371_v25, 16 }
  0x43   : > { %v804_v29 = vadd.f32 %v794_v50, %v2484_v24  ;;  %v961_v5 = vrot.slane %v959_v12, 7  ;;  %v967_v7 = vrot.slane %v965_v63, 7  ;;  %v977_v9 = vshrl.u32 %v2416_v56, 16 }
  0x44   : > { %v815_v60 = vpack.c.bf16 %v805_v49, %v805_v49  ;;  %v971_v10 = vshrl.u32 %v2384_v2, 16  ;;  %v980_v14 = vshll.u32 %v2416_v56, 16  ;;  %v974_v32 = vshll.u32 %v2384_v2, 16 }
  0x45   : > { %v814_v59 = vpack.c.bf16 %v804_v29, %v804_v29  ;;  %v2516_v16 = vor.u32 %v962_v4, %v961_v5  ;;  %v983_v21 = vshrl.u32 %v2433_v57, 16  ;;  %v989_v56 = vshrl.u32 %v2452_v26, 16 }
  0x46   : > { %v2507_v62 = vsel %vm886_vm2, %v815_v60, %v2336_v58  ;;  %v2518_v58 = vor.u32 %v968_v6, %v967_v7  ;;  %v973_v25 = vrot.slane %v971_v10, 7  ;;  %v777_v23 = vpack.c.bf16 %v2435_v15, %v2435_v15 }
  0x47   : > { %v2503_v61 = vsel %vm886_vm2, %v814_v59, %v2270_v28  ;;  %v979_v28 = vrot.slane %v977_v9, 7  ;;  %v1022_v31 = vsel %vm2494_vm6, 0, %v2516_v16  ;;  %v778_v0 = vpack.c.bf16 %v2442_v20, %v2442_v20 }
  0x48   : > { %v1023_v8 = vsel %vm2494_vm6, 0, %v2518_v58  ;;  %v2538_v27 = vor.u32 %v974_v32, %v973_v25  ;;  %v986_v2 = vshll.u32 %v2433_v57, 16  ;;  %v985_v41 = vrot.slane %v983_v21, 7 }
  0x49   : > { %v2527_v19 = vor.u32 %v980_v14, %v979_v28  ;;  %v991_v46 = vrot.slane %v989_v56, 7  ;;  %v992_v33 = vshll.u32 %v2452_v26, 16  ;;  %v779_v20 = vpack.c.bf16 %v2446_v17, %v2446_v17 }
  0x4a   : > { %v1024_v36 = vsel %vm2494_vm6, 0, %v2538_v27  ;;  %v947_v57 = vshrl.u32 %v2409_v53, 16  ;;  %v692_v26 = vrot.slane %v2387_v37, 7  ;;  %v2558_v43 = vor.u32 %v986_v2, %v985_v41  ;;  %v2040_v2 = vld [vmem:[%s2820_s6 + $0x10] sm:$0xff]  }
  0x4b   : > { %v1025_v22 = vsel %vm2494_vm6, 0, %v2527_v19  ;;  %v2556_v40 = vor.u32 %v992_v33, %v991_v46  ;;  %v781_v13 = vpack.c.bf16 %v2455_v34, %v2455_v34  ;;  %v693_v50 = vrot.slane %v2393_v44, 7  ;;  %1932 = vmatprep.subr.bf16.mxu1 %v2040_v2 }
  0x4c   : > { %v1026_v48 = vsel %vm2494_vm6, 0, %v2558_v43  ;;  %v949_v51 = vrot.slane %v947_v57, 7  ;;  %v950_v29 = vshll.u32 %v2409_v53, 16  ;;  %v713_v34 = vsel %vm704_vm4, %v2387_v37, %v692_v26  ;;  %1933 = vmatpush3.bf16.msra.mxu1 %v2040_v2 }
  0x4d   : > { %v1027_v3 = vsel %vm2494_vm6, 0, %v2556_v40  ;;  %v783_v4 = vpack.c.bf16 %v2468_v38, %v2468_v38  ;;  %v780_v53 = vpack.c.bf16 %v2462_v35, %v2462_v35  ;;  %v754_v7 = vmul.f32 0.25, %v713_v34 }
  0x4e   : > { %v714_v37 = vsel %vm704_vm4, %v2393_v44, %v693_v50  ;;  %v2582_v28 = vor.u32 %v950_v29, %v949_v51  ;;  %v782_v44 = vpack.c.bf16 %v2477_v47, %v2477_v47  ;;  %v776_v26 = vpack.c.bf16 %v2475_v45, %v2475_v45  ;;  %v2626_v50 = vld [vmem:[%s2820_s6] sm:$0xff]  }
  0x4f   : > { %v755_v21 = vmul.f32 0.25, %v714_v37  ;;  %1944 = vmatprep.subr.bf16.mxu0 %v2626_v50 }
  0x50   : > { %v1020_v56 = vsel %vm2494_vm6, 0, %v2582_v28  ;;  %1945 = vmatpush3.bf16.msra.mxu0 %v2626_v50 }
  0x8b   : > { %v871_v11 = vpop.permute.xlu1 %870  ;;  %v869_v18 = vpop.permute.xlu0 %868 }
  0x8c   : > { %v892_v39 = vsel %vm886_vm2, %v777_v23, %v869_v18  ;;  %v2547_v15 = vsel %vm886_vm2, %v778_v0, %v871_v11  ;;  %v774_v0 = vadd.f32 %v2484_v24, %v754_v7 }
  0x8d   : > { %1125 = vrot.lane.b32.xlu1 %v892_v39, %s2088_s24  ;;  %1127 = vrot.lane.b32.xlu0 %v2547_v15, %s2088_s24  ;;  %v1038_v54 = vshll.u32 %v892_v39, 16  ;;  %v1036_v5 = vshrl.u32 %v892_v39, 16  ;;  %v775_v39 = vadd.f32 %v2487_v30, %v755_v21  ;;  %v1044_v24 = vshll.u32 %v2547_v15, 16 }
  0x8e   : > { %v784_v57 = vpack.c.bf16 %v774_v0, %v774_v0  ;;  %v1042_v29 = vshrl.u32 %v2547_v15, 16  ;;  %v2641_v15 = vld [vmem:[%s2820_s6 + $0x8] sm:$0xff]   ;;  %v2659_v0 = vld [vmem:[%s2820_s6 + $0x20] sm:$0xff]  }
  0x8f   : > { %v873_v42 = vpop.permute.xlu1 %872  ;;  %v1040_v60 = vrot.slane %v1038_v54, 1  ;;  %v785_v45 = vpack.c.bf16 %v775_v39, %v775_v39  ;;  %1946 = vmatprep.subr.bf16.mxu0 %v2641_v15 }
  0x90   : > { %v898_v17 = vsel %vm886_vm2, %v779_v20, %v873_v42  ;;  %v867_v12 = vpop.permute.xlu0 %866  ;;  %1947 = vmatpush3.bf16.msra.mxu0 %v2641_v15 }
  0x91   : > { %1129 = vrot.lane.b32.xlu1 %v898_v17, %s2088_s24  ;;  %v1050_v49 = vshll.u32 %v898_v17, 16  ;;  %v1048_v6 = vshrl.u32 %v898_v17, 16  ;;  %v1041_v32 = vor.u32 %v1040_v60, %v1036_v5  ;;  %v2041_v17 = vld [vmem:[%s2820_s6 + $0x18] sm:$0xff]   ;;  %v889_v60 = vsel %vm886_vm2, %v776_v26, %v867_v12  ;;  %1956 = vmatprep.subr.bf16.mxu0 %v2659_v0 }
  0x92   : > { %1934 = vmatprep.subr.bf16.mxu1 %v2041_v17  ;;  %v1032_v7 = vshll.u32 %v889_v60, 16  ;;  %v1030_v2 = vshrl.u32 %v889_v60, 16 }
  0x93   : > { %v877_v59 = vpop.permute.xlu1 %876  ;;  %v1052_v9 = vrot.slane %v1050_v49, 1  ;;  %v1104_v18 = vsel %vm2596_vm9, %v1041_v32, 0  ;;  %v1046_v49 = vrot.slane %v1044_v24, 1  ;;  %1935 = vmatpush3.bf16.msra.mxu1 %v2041_v17 }
  0x94   : > { %v904_v63 = vsel %vm886_vm2, %v781_v13, %v877_v59  ;;  %v875_v25 = vpop.permute.xlu0 %874  ;;  %1968 = vmatprep.subr.bf16.mxu1 %v2626_v50 }
  0x95   : > { %1133 = vrot.lane.b32.xlu1 %v904_v63, %s2088_s24  ;;  %v1062_v10 = vshll.u32 %v904_v63, 16  ;;  %v2589_v35 = vsel %vm886_vm2, %v780_v53, %v875_v25  ;;  %v1060_v41 = vshrl.u32 %v904_v63, 16  ;;  %v1053_v11 = vor.u32 %v1052_v9, %v1048_v6 }
  0x96   : > { %1131 = vrot.lane.b32.xlu0 %v2589_v35, %s2088_s24  ;;  %v1056_v34 = vshll.u32 %v2589_v35, 16  ;;  %v1047_v12 = vor.u32 %v1046_v49, %v1042_v29 }
  0x97   : > { %v881_v14 = vpop.permute.xlu1 %880  ;;  %v1064_v46 = vrot.slane %v1062_v10, 1  ;;  %v1106_v30 = vsel %vm2596_vm9, %v1053_v11, 0 }
  0x98   : > { %v910_v38 = vsel %vm886_vm2, %v783_v4, %v881_v14  ;;  %v879_v47 = vpop.permute.xlu0 %878  ;;  %v1058_v53 = vrot.slane %v1056_v34, 1  ;;  %v1054_v14 = vshrl.u32 %v2589_v35, 16  ;;  %v1105_v32 = vsel %vm2596_vm9, %v1047_v12, 0 }
  0x99   : > { %1137 = vrot.lane.b32.xlu1 %v910_v38, %s2088_s24  ;;  %v1074_v33 = vshll.u32 %v910_v38, 16  ;;  %v2611_v20 = vsel %vm886_vm2, %v782_v44, %v879_v47  ;;  %v1072_v42 = vshrl.u32 %v910_v38, 16  ;;  %v1065_v54 = vor.u32 %v1064_v46, %v1060_v41 }
  0x9a   : > { %1135 = vrot.lane.b32.xlu0 %v2611_v20, %s2088_s24  ;;  %v1034_v38 = vrot.slane %v1032_v7, 1  ;;  %v1059_v21 = vor.u32 %v1058_v53, %v1054_v14  ;;  %v1068_v35 = vshll.u32 %v2611_v20, 16  ;;  %v1066_v39 = vshrl.u32 %v2611_v20, 16 }
  0x9b   : > { %v1076_v13 = vrot.slane %v1074_v33, 1  ;;  %v1108_v63 = vsel %vm2596_vm9, %v1065_v54, 0 }
  0x9c   : > { %v883_v51 = vpop.permute.xlu0 %882  ;;  %v1107_v41 = vsel %vm2596_vm9, %v1059_v21, 0  ;;  %v1035_v46 = vor.u32 %v1034_v38, %v1030_v2  ;;  %v1070_v11 = vrot.slane %v1068_v35, 1 }
  0x9d   : > { %1185 = vrot.lane.b32.xlu1 %v1104_v18, %s2089_s25  ;;  %v913_v59 = vsel %vm886_vm2, %v784_v57, %v883_v51  ;;  %v1077_v4 = vor.u32 %v1076_v13, %v1072_v42  ;;  %v885_v5 = vpop.permute.xlu1 %884 }
  0x9e   : > { %1139 = vrot.lane.b32.xlu0 %v913_v59, %s2088_s24  ;;  %v916_v37 = vsel %vm886_vm2, %v785_v45, %v885_v5  ;;  %v1080_v47 = vshll.u32 %v913_v59, 16  ;;  %v1103_v18 = vsel %vm2596_vm9, %v1035_v46, 0  ;;  %v1071_v57 = vor.u32 %v1070_v11, %v1066_v39 }
  0x9f   : > { %v1110_v6 = vsel %vm2596_vm9, %v1077_v4, 0  ;;  %v1084_v9 = vshrl.u32 %v916_v37, 16  ;;  %v1086_v10 = vshll.u32 %v916_v37, 16  ;;  %v1078_v26 = vshrl.u32 %v913_v59, 16 }
  0xa0   : > { %v1082_v24 = vrot.slane %v1080_v47, 1  ;;  %v1109_v42 = vsel %vm2596_vm9, %v1071_v57, 0  ;;  %v1001_v47 = vshrl.u32 %v2507_v62, 16  ;;  %v998_v39 = vshll.u32 %v2503_v61, 16 }
  0xa1   : > { %1189 = vrot.lane.b32.xlu1 %v1106_v30, %s2089_s25  ;;  %v1088_v25 = vrot.slane %v1086_v10, 1  ;;  %v1158_v20 = vpop.permute.xlu1 %1157  ;;  %v1160_v45 = vpop.permute.xlu0 %1159 }
  0xa2   : > { %1123 = vrot.lane.b32.xlu0 %v889_v60, %s2088_s24  ;;  %v1083_v13 = vor.u32 %v1082_v24, %v1078_v26  ;;  %v1003_v26 = vrot.slane %v1001_v47, 7 }
  0xa3   : > { %v1089_v44 = vor.u32 %v1088_v25, %v1084_v9 }
  0xa4   : > { %v1111_v30 = vsel %vm2596_vm9, %v1083_v13, 0  ;;  %v2045_v13 = vld [vmem:[%s2820_s6 + $0x28] sm:$0xff]  }
  0xa5   : > { %1193 = vrot.lane.b32.xlu1 %v1108_v63, %s2089_s25  ;;  %v1112_v33 = vsel %vm2596_vm9, %v1089_v44, 0  ;;  %v1162_v54 = vpop.permute.xlu1 %1161  ;;  %v995_v44 = vshrl.u32 %v2503_v61, 16 }
  0xa6   : > { %1187 = vrot.lane.b32.xlu0 %v1105_v32, %s2089_s25 }
  0xa7   : > { %v1156_v49 = vpop.permute.xlu0 %1155 }
  0xa9   : > { %1197 = vrot.lane.b32.xlu1 %v1110_v6, %s2089_s25  ;;  %v1154_v17 = vpop.permute.xlu1 %1153 }
  0xaa   : > { %1191 = vrot.lane.b32.xlu0 %v1107_v41, %s2089_s25 }
  0xad   : > { %1141 = vrot.lane.b32.xlu1 %v916_v37, %s2088_s24  ;;  %v1164_v51 = vpop.permute.xlu1 %1163  ;;  %v2686_v59 = vpop.permute.xlu0 %1165  ;;  %s1852_s24 = sshll.u32 %s2176_s16, 3 }
  0xae   : > { %1183 = vrot.lane.b32.xlu0 %v1103_v18, %s2089_s25  ;;  %v997_v18 = vrot.slane %v995_v44, 7 }
  0xb1   : > { %1201 = vrot.lane.b32.xlu1 %v1112_v33, %s2089_s25  ;;  %v2684_v29 = vpop.permute.xlu1 %1167 }
  0xb2   : > { %1169 = vrot.lane.b32.xlu0 %v2503_v61, %s2087_s22  ;;  %v1000_v61 = vor.u32 %v998_v39, %v997_v18 }
  0xb4   : > { %v1028_v40 = vsel %vm2494_vm6, 0, %v1000_v61 }
  0xb6   : > { %1195 = vrot.lane.b32.xlu0 %v1109_v42, %s2089_s25  ;;  %v1004_v42 = vshll.u32 %v2507_v62, 16 }
  0xba   : > { %1199 = vrot.lane.b32.xlu0 %v1111_v30, %s2089_s25  ;;  %s2789_s25 = scalar_lea.vmem %s2822_s8, %s1852_s24 }
  0xbe   : > { %1171 = vrot.lane.b32.xlu0 %v2507_v62, %s2087_s22 }
  0xff   : > { %v1126_v34 = vpop.permute.xlu1 %1125  ;;  %v1128_v23 = vpop.permute.xlu0 %1127 }
 0x100   : > { %v1209_v9 = vsel %vm1203_vm10, %v1021_v1, %v1126_v34  ;;  %v1212_v10 = vsel %vm1203_vm10, %v1022_v31, %v1128_v23 }
 0x101   : > { %v1238_v1 = vsel %vm1234_vm11, %v1209_v9, %v1156_v49  ;;  %v1240_v31 = vsel %vm1234_vm11, %v1212_v10, %v1158_v20 }
 0x103   : > { %v1130_v60 = vpop.permute.xlu1 %1129 }
 0x104   : > { %v1215_v14 = vsel %vm1203_vm10, %v1023_v8, %v1130_v60 }
 0x105   : > { %v1242_v16 = vsel %vm1234_vm11, %v1215_v14, %v1160_v45  ;;  %v1898_v14 = vld [vmem:[%s2821_s7] ss:$0 sm:$0xff] }
 0x107   : > { %v1134_v63 = vpop.permute.xlu1 %1133 }
 0x108   : > { %v1132_v4 = vpop.permute.xlu0 %1131  ;;  %v1221_v52 = vsel %vm1203_vm10, %v1025_v22, %v1134_v63 }
 0x109   : > { %v1218_v58 = vsel %vm1203_vm10, %v1024_v36, %v1132_v4  ;;  %v1246_v2 = vsel %vm1234_vm11, %v1221_v52, %v1164_v51 }
 0x10a   : > { %v1244_v35 = vsel %vm1234_vm11, %v1218_v58, %v1162_v54  ;;  %v1006_v54 = vor.u32 %v1004_v42, %v1003_v26 }
 0x10b   : > { %v1138_v5 = vpop.permute.xlu1 %1137 }
 0x10c   : > { %v1136_v53 = vpop.permute.xlu0 %1135  ;;  %v1029_v49 = vsel %vm2494_vm6, 0, %v1006_v54 }
 0x10d   : > { %v1224_v62 = vsel %vm1203_vm10, %v1026_v48, %v1136_v53 }
 0x10e   : > { %v1248_v43 = vsel %vm1234_vm11, %v1224_v62, %v2686_v59 }
 0x10f   : > { %v1186_v7 = vpop.permute.xlu1 %1185 }
 0x110   : > { %v2688_v12 = vpop.permute.xlu0 %1139  ;;  %v1259_v8 = vsel %vm1255_vm12, %v1238_v1, %v1186_v7 }
 0x113   : > { %v1190_v37 = vpop.permute.xlu1 %1189 }
 0x114   : > { %v1124_v6 = vpop.permute.xlu0 %1123  ;;  %v1263_v38 = vsel %vm1255_vm12, %v1242_v16, %v1190_v37 }
 0x115   : > { %v1206_v36 = vsel %vm1203_vm10, %v1020_v56, %v1124_v6 }
 0x116   : > { %v1236_v24 = vsel %vm1234_vm11, %v1206_v36, %v1154_v17 }
 0x117   : > { %v1194_v22 = vpop.permute.xlu1 %1193 }
 0x118   : > { %v1188_v25 = vpop.permute.xlu0 %1187  ;;  %v1267_v41 = vsel %vm1255_vm12, %v1246_v2, %v1194_v22 }
 0x119   : > { %v1261_v19 = vsel %vm1255_vm12, %v1240_v31, %v1188_v25 }
 0x11a   : > { %v1878_v32 = vcombine.low %v1261_v19, %v1263_v38  ;;  %v1867_v21 = vcombine.low %v1259_v8, %v1261_v19 }
 0x11b   : > { %v1198_v20 = vpop.permute.xlu1 %1197 }
 0x11c   : > { %1936 = vmatprep.mubr.msk.bf16.mxu1 %vm1317_vm13, %v1867_v21  ;;  %v1192_v27 = vpop.permute.xlu0 %1191 }
 0x11d   : > { %v1265_v46 = vsel %vm1255_vm12, %v1244_v35, %v1192_v27 }
 0x11e   : > { %v1868_v33 = vcombine.low %v1263_v38, %v1265_v46  ;;  %v1879_v11 = vcombine.low %v1265_v46, %v1267_v41 }
 0x11f   : > { %v1142_v34 = vpop.permute.xlu1 %1141 }
 0x120   : > { %1937 = vmatmul.mubr.msk.bf16.vlgmr.msra.gmra.mrb[0].mxu1 %vm1317_vm13, %v1868_v33  ;;  %v1184_v57 = vpop.permute.xlu0 %1183  ;;  %v1233_v23 = vsel %vm1203_vm10, %v1029_v49, %v1142_v34 }
 0x121   : > { %v1257_v28 = vsel %vm1255_vm12, %v1236_v24, %v1184_v57  ;;  %1970 = vmatpush3.bf16.msra.mxu1 %v2626_v50  ;;  %v1227_v50 = vsel %vm1203_vm10, %v1027_v3, %v1138_v5 }
 0x122   : > { %v1877_v56 = vcombine.low %v1257_v28, %v1259_v8  ;;  %1969 = vmatprep.subr.bf16.mxu1 %v2641_v15  ;;  %v1250_v3 = vsel %vm1234_vm11, %v1227_v50, %v2684_v29 }
 0x123   : > { %v1271_v17 = vsel %vm1255_vm12, %v1250_v3, %v1198_v20  ;;  %v1202_v53 = vpop.permute.xlu1 %1201 }
 0x124   : > { %1948 = vmatprep.mubr.msk.bf16.mxu0 %vm1317_vm13, %v1877_v56  ;;  %v1170_v30 = vpop.permute.xlu0 %1169 }
 0x125   : > { %1949 = vmatmul.mubr.msk.bf16.vlgmr.msra.gmra.mrb[0].mxu0 %vm1317_vm13, %v1878_v32  ;;  %1971 = vmatpush3.bf16.msra.mxu1 %v2641_v15 }
 0x126   : > { %1960 = vmatprep.mubr.msk.bf16.mxu0 %vm1317_vm13, %v1878_v32  ;;  %1957 = vmatpush3.bf16.msra.mxu0 %v2659_v0  ;;  %v1230_v0 = vsel %vm1203_vm10, %v1028_v40, %v2688_v12 }
 0x127   : > { %1958 = vmatprep.subr.bf16.mxu0 %v2045_v13  ;;  %v1252_v29 = vsel %vm1234_vm11, %v1230_v0, %v1170_v30 }
 0x128   : > { %v1196_v48 = vpop.permute.xlu0 %1195 }
 0x129   : > { %v1269_v15 = vsel %vm1255_vm12, %v1248_v43, %v1196_v48 }
 0x12a   : > { %v1869_v51 = vcombine.low %v1267_v41, %v1269_v15  ;;  %v1880_v45 = vcombine.low %v1269_v15, %v1271_v17  ;;  %1959 = vmatpush3.bf16.msra.mxu0 %v2045_v13 }
 0x12c   : > { %1940 = vmatprep.mubr.msk.bf16.mxu1 %vm1317_vm13, %v1869_v51  ;;  %v1200_v59 = vpop.permute.xlu0 %1199 }
 0x12d   : > { %v1273_v60 = vsel %vm1255_vm12, %v1252_v29, %v1200_v59 }
 0x12e   : > { %v1870_v63 = vcombine.low %v1271_v17, %v1273_v60 }
 0x130   : > { %1941 = vmatmul.mubr.msk.bf16.gmra.mrb[4].mxu1 %vm1317_vm13, %v1870_v63  ;;  %v1172_v4 = vpop.permute.xlu0 %1171 }
 0x131   : > { %v1254_v5 = vsel %vm1234_vm11, %v1233_v23, %v1172_v4  ;;  %1952 = vmatprep.mubr.msk.bf16.mxu1 %vm1317_vm13, %v1879_v11  ;;  %1961 = vmatmul.mubr.msk.bf16.vlgmr.msra.gmra.mrb[0].mxu0 %vm1317_vm13, %v1879_v11 }
 0x132   : > { %1964 = vmatprep.mubr.msk.bf16.mxu0 %vm1317_vm13, %v1880_v45  ;;  %v1275_v55 = vsel %vm1255_vm12, %v1254_v5, %v1202_v53 }
 0x133   : > { %v1891_v7 = vcombine.low %v1273_v60, %v1275_v55 }
 0x139   : > { %1965 = vmatmul.mubr.msk.bf16.gmra.mrb[4].mxu0 %vm1317_vm13, %v1891_v7 }
 0x13c   : > { %1953 = vmatmul.mubr.msk.bf16.vlgmr.msra.gmra.mrb[4].mxu1 %vm1317_vm13, %v1880_v45 }
 0x1f3   : > { %v1938_v12 = vpop.f32.mrb[0].mxu1 }
 0x1f4   : > { %v1364_v37 = vpop.f32.mrb[1].mxu1 }
 0x1f5   : > { %v1939_v6 = vpop.f32.mrb[2].mxu1 }
 0x1f6   : > { %v1367_v9 = vpop.f32.mrb[3].mxu1 }
 0x204   : > { %v1962_v10 = vpop.f32.mrb[0].mxu0 }
 0x205   : > { %v1972_v52 = vadd.f32 %v1962_v10, %v1938_v12  ;;  %v1547_v1 = vpop.f32.mrb[1].mxu0 }
 0x206   : > { %v1973_v16 = vadd.f32 %v1547_v1, %v1364_v37  ;;  %v1963_v31 = vpop.f32.mrb[2].mxu0 }
 0x207   : > { %v1595_v25 = vadd.f32 %v1972_v52, %v1898_v14  ;;  %v1974_v58 = vadd.f32 %v1963_v31, %v1939_v6  ;;  %v1550_v8 = vpop.f32.mrb[3].mxu0 }
 0x208   : > { %v1593_v38 = vadd.f32 %v1973_v16, %v1898_v14  ;;  %v1975_v19 = vadd.f32 %v1550_v8, %v1367_v9 }
 0x209   : > { %v1603_v22 = vmax.f32 %v1595_v25, 0.0  ;;  %v1596_v32 = vadd.f32 %v1974_v58, %v1898_v14 }
 0x20a   : > { %v1601_v21 = vmax.f32 %v1593_v38, 0.0  ;;  %v1594_v44 = vadd.f32 %v1975_v19, %v1898_v14 }
 0x20b   : > { %1611 = vst [vmem:[%s2789_s25 + $0x10] sm:$0xff] %v1603_v22  ;;  %v1604_v2 = vmax.f32 %v1596_v32, 0.0 }
 0x20c   : > { %1609 = vst [vmem:[%s2789_s25] sm:$0xff] %v1601_v21  ;;  %v1602_v35 = vmax.f32 %v1594_v44, 0.0  ;;  %v1966_v27 = vpop.f32.mrb[4].mxu0 }
 0x20d   : > { %1612 = vst [vmem:[%s2789_s25 + $0x18] sm:$0xff] %v1604_v2  ;;  %v1563_v36 = vpop.f32.mrb[5].mxu0 }
 0x20e   : > { %1610 = vst [vmem:[%s2789_s25 + $0x8] sm:$0xff] %v1602_v35  ;;  %v1967_v41 = vpop.f32.mrb[6].mxu0 }
 0x20f   : > { %v1954_v46 = vpop.f32.mrb[4].mxu1  ;;  %v1566_v33 = vpop.f32.mrb[7].mxu0 }
 0x210   : > { %v1976_v11 = vadd.f32 %v1966_v27, %v1954_v46  ;;  %v1475_v47 = vpop.f32.mrb[5].mxu1 }
 0x211   : > { %v1977_v18 = vadd.f32 %v1563_v36, %v1475_v47  ;;  %v1955_v39 = vpop.f32.mrb[6].mxu1 }
 0x212   : > { %v1599_v24 = vadd.f32 %v1976_v11, %v1898_v14  ;;  %v1978_v57 = vadd.f32 %v1967_v41, %v1955_v39  ;;  %v1478_v28 = vpop.f32.mrb[7].mxu1 }
 0x213   : > { %v1597_v56 = vadd.f32 %v1977_v18, %v1898_v14  ;;  %v1979_v26 = vadd.f32 %v1566_v33, %v1478_v28 }
 0x214   : > { %v1607_v42 = vmax.f32 %v1599_v24, 0.0  ;;  %v1600_v13 = vadd.f32 %v1978_v57, %v1898_v14 }
 0x215   : > { %v1605_v61 = vmax.f32 %v1597_v56, 0.0  ;;  %v1598_v30 = vadd.f32 %v1979_v26, %v1898_v14 }
 0x216   : > { %1615 = vst [vmem:[%s2789_s25 + $0x30] sm:$0xff] %v1607_v42  ;;  %v1608_v50 = vmax.f32 %v1600_v13, 0.0 }
 0x217   : > { %1613 = vst [vmem:[%s2789_s25 + $0x20] sm:$0xff] %v1605_v61  ;;  %v1606_v62 = vmax.f32 %v1598_v30, 0.0 }
 0x218   : > { %1616 = vst [vmem:[%s2789_s25 + $0x38] sm:$0xff] %v1608_v50 }
 0x219   : > { %1614 = vst [vmem:[%s2789_s25 + $0x28] sm:$0xff] %v1606_v62 }
 0x21a PF: > { %s18_s9 = sadd.s32 1, %s2084_s9   ;;  %s2833_s27 = smov %s2076_s29 }
 0x21b   : > { %p15_p2 = scmp.ge.s32.totalorder %s18_s9, 6   ;;  %s2834_s28 = smov %s2080_s30 }
 0x21c   : > { %s2835_s29 = smov %s2838_s10  ;;  %s2836_s30 = smov %s2842_s11 }
 0x21d   :  { %17 = sbr.rel (!%p15_p2) target bundleno = 3 (0x3), region = 99 }

</bundles_post_ra>
